<compile_context>
chip_gen: v5e
topology: v5e:2x2
jax: 0.10.0
libtpu: 0.0.40
codegen_flags: <defaults>
</compile_context>

<pallas_src>
import functools

import jax
import jax.numpy as jnp
from jax.experimental import pallas as pl
from jax.experimental.pallas import tpu as pltpu

HIDDEN = 32            # hidden width of the DQN MLP (from the PyTorch module)
LANE = 128             # TPU lane width
SUBLANE = 8            # TPU sublane width
MAX_BATCH_TILE = 4096  # batch rows per grid step (amortizes ~0.35us/step)
MIN_SPLIT_BATCH = 256  # force >=2 tiles above this so v7x's 2nd TC gets work


def _round_up(x, m):
    return (x + m - 1) // m * m


def _cdiv(a, b):
    return (a + b - 1) // b


def _mlp_kernel(x_ref, w1_ref, b1_ref, w2_ref, b2_ref, w3_ref, b3_ref, o_ref,
                *, num_actions):
    """Fused 3-layer MLP on one batch tile.

    x_ref : [bt, num_states]      f32  (cast to bf16 in-kernel)
    w1_ref: [num_states, 32] bf16   b1_ref: [1, 32]  f32
    w2_ref: [32, 32]         bf16   b2_ref: [1, 32]  f32
    w3_ref: [32, ncols_out]  bf16   b3_ref: [1, ncols_out] f32 (lane-padded)
    o_ref : [bt, num_actions] f32   (narrow store, no zero padding to HBM)
    """
    x = x_ref[...].astype(jnp.bfloat16)

    # layer 1: Linear(num_states, 32) + ReLU   (bf16 MXU inputs, f32 acc)
    h1 = jnp.dot(x, w1_ref[...], preferred_element_type=jnp.float32) + b1_ref[...]
    h1 = jnp.maximum(h1, 0.0).astype(jnp.bfloat16)

    # layer 2: Linear(32, 32) + ReLU
    h2 = jnp.dot(h1, w2_ref[...], preferred_element_type=jnp.float32) + b2_ref[...]
    h2 = jnp.maximum(h2, 0.0).astype(jnp.bfloat16)

    # layer 3: Linear(32, num_actions) -> logits (lane-padded matmul, narrow store)
    out = jnp.dot(h2, w3_ref[...], preferred_element_type=jnp.float32) + b3_ref[...]
    o_ref[...] = out[:, :num_actions].astype(o_ref.dtype)


def linear_dqn_forward(x, packed):
    """x: [B, num_states] float32.  packed: output of pack_params()."""
    p = packed
    B, num_states = x.shape
    num_actions = p["num_actions"]

    # Tile the batch: minimal over-padding (<= ~8 rows) and, once B is large
    # enough, at least 2 tiles so "parallel" sharding feeds both v7x TCs.
    n_tiles = max(1, _cdiv(B, MAX_BATCH_TILE))
    if B >= MIN_SPLIT_BATCH:
        n_tiles = max(n_tiles, 2)
    bt = _round_up(_cdiv(B, n_tiles), SUBLANE)

    kernel = functools.partial(_mlp_kernel, num_actions=num_actions)

    flops = 2 * B * (num_states * HIDDEN + HIDDEN * HIDDEN + HIDDEN * num_actions)
    param_bytes = int(p["w1"].size + p["w2"].size + p["w3"].size) * 2 \
        + int(p["b1"].size + p["b2"].size + p["b3"].size) * 4
    bytes_accessed = B * num_states * 4 + B * num_actions * 4 + param_bytes

    out = pl.pallas_call(
        kernel,
        out_shape=jax.ShapeDtypeStruct((B, num_actions), jnp.float32),
        grid=(n_tiles,),
        in_specs=[
            # batch-tiled activations (pipelined / double-buffered by Pallas);
            # last dim == full array dim, so no feature padding needed.
            pl.BlockSpec((bt, num_states), lambda i: (i, 0)),
            # params: constant block index -> fetched once, VMEM resident.
            pl.BlockSpec(p["w1"].shape, lambda i: (0, 0)),
            pl.BlockSpec(p["b1"].shape, lambda i: (0, 0)),
            pl.BlockSpec(p["w2"].shape, lambda i: (0, 0)),
            pl.BlockSpec(p["b2"].shape, lambda i: (0, 0)),
            pl.BlockSpec(p["w3"].shape, lambda i: (0, 0)),
            pl.BlockSpec(p["b3"].shape, lambda i: (0, 0)),
        ],
        # Narrow output: last dim == full array dim (num_actions) is legal.
        out_specs=pl.BlockSpec((bt, num_actions), lambda i: (i, 0)),
        compiler_params=pltpu.CompilerParams(
            dimension_semantics=("parallel",),      # shard batch tiles across TCs
            vmem_limit_bytes=32 * 1024 * 1024,      # headroom for bt=4096 tiles
        ),
        cost_estimate=pl.CostEstimate(
            flops=flops, transcendentals=0, bytes_accessed=bytes_accessed),
    )(x, p["w1"], p["b1"], p["w2"], p["b2"], p["w3"], p["b3"])

    return out


def init_params(key, num_states, num_actions):
    """Deterministic init mimicking nn.Linear default (uniform +/- 1/sqrt(fan_in)).

    Weights stored as [in_features, out_features] (transposed from PyTorch)."""
    def linear_init(k, fan_in, fan_out):
        kw, kb = jax.random.split(k)
        bound = 1.0 / jnp.sqrt(fan_in)
        wgt = jax.random.uniform(kw, (fan_in, fan_out), jnp.float32, -bound, bound)
        bias = jax.random.uniform(kb, (1, fan_out), jnp.float32, -bound, bound)
        return wgt, bias

    k1, k2, k3 = jax.random.split(key, 3)
    w1, b1 = linear_init(k1, num_states, HIDDEN)
    w2, b2 = linear_init(k2, HIDDEN, HIDDEN)
    w3, b3 = linear_init(k3, HIDDEN, num_actions)
    return dict(w1=w1, b1=b1, w2=w2, b2=b2, w3=w3, b3=b3)


def pack_params(params, num_states, num_actions):
    """Prepare kernel-side params: bf16 weights, natural 32-wide hidden
    layers, and only w3/b3 zero-padded to a lane-dense 128-column width
    (padded columns are sliced off before the store, so they never hit HBM)."""
    ncols_out = _round_up(num_actions, LANE)

    w3 = jnp.zeros((HIDDEN, ncols_out), jnp.float32)
    w3 = w3.at[:, :num_actions].set(params["w3"])
    b3 = jnp.zeros((1, ncols_out), jnp.float32)
    b3 = b3.at[:, :num_actions].set(params["b3"])

    return dict(
        w1=params["w1"].astype(jnp.bfloat16), b1=params["b1"],
        w2=params["w2"].astype(jnp.bfloat16), b2=params["b2"],
        w3=w3.astype(jnp.bfloat16), b3=b3,
        num_states=num_states, num_actions=num_actions,
    )


def reference_forward(x, params):
    """Pure-JAX reference with the same bf16 cast points as the kernel."""
    w1 = params["w1"].astype(jnp.bfloat16)
    w2 = params["w2"].astype(jnp.bfloat16)
    w3 = params["w3"].astype(jnp.bfloat16)
    xb = x.astype(jnp.bfloat16)
    h1 = jnp.maximum(jnp.dot(xb, w1, preferred_element_type=jnp.float32)
                     + params["b1"], 0.0).astype(jnp.bfloat16)
    h2 = jnp.maximum(jnp.dot(h1, w2, preferred_element_type=jnp.float32)
                     + params["b2"], 0.0).astype(jnp.bfloat16)
    return jnp.dot(h2, w3, preferred_element_type=jnp.float32) + params["b3"]


if __name__ == "__main__":
    num_states, num_actions, batch = 4, 2, 8

    key = jax.random.PRNGKey(0)
    kx, kp = jax.random.split(key)
    x = jax.random.normal(kx, (batch, num_states), jnp.float32)
    params = init_params(kp, num_states, num_actions)
    packed = pack_params(params, num_states, num_actions)

    out = linear_dqn_forward(x, packed)
    out = jax.block_until_ready(out)

    ref = reference_forward(x, params)
    assert out.shape == (batch, num_actions)
    assert jnp.allclose(out, ref, atol=1e-3, rtol=1e-3), "mismatch vs reference"

    print("KERNEL_OK")
</pallas_src>

<mosaic_0001>
module attributes {stable_mosaic.version = 11 : i64} {
  func.func @_mlp_kernel(%arg0: i32, %arg1: memref<8x4xf32, #tpu.memory_space<vmem>>, %arg2: memref<4x32xbf16, #tpu.memory_space<vmem>>, %arg3: memref<1x32xf32, #tpu.memory_space<vmem>>, %arg4: memref<32x32xbf16, #tpu.memory_space<vmem>>, %arg5: memref<1x32xf32, #tpu.memory_space<vmem>>, %arg6: memref<32x128xbf16, #tpu.memory_space<vmem>>, %arg7: memref<1x128xf32, #tpu.memory_space<vmem>>, %arg8: memref<8x2xf32, #tpu.memory_space<vmem>>) attributes {dimension_semantics = [#tpu.dimension_semantics<parallel>], iteration_bounds = array<i64: 1>, scalar_prefetch = 0 : i64, scratch_operands = 0 : i64, tpu.core_type = #tpu.core_type<tc>, window_params = [{transform_indices = @transform_0, window_bounds = array<i64: 8, 4>}, {pipeline_mode = #tpu.pipeline_mode<synchronous>, transform_indices = @transform_1, window_bounds = array<i64: 4, 32>}, {pipeline_mode = #tpu.pipeline_mode<synchronous>, transform_indices = @transform_2, window_bounds = array<i64: 1, 32>}, {pipeline_mode = #tpu.pipeline_mode<synchronous>, transform_indices = @transform_3, window_bounds = array<i64: 32, 32>}, {pipeline_mode = #tpu.pipeline_mode<synchronous>, transform_indices = @transform_4, window_bounds = array<i64: 1, 32>}, {pipeline_mode = #tpu.pipeline_mode<synchronous>, transform_indices = @transform_5, window_bounds = array<i64: 32, 128>}, {pipeline_mode = #tpu.pipeline_mode<synchronous>, transform_indices = @transform_6, window_bounds = array<i64: 1, 128>}, {transform_indices = @transform_7, window_bounds = array<i64: 8, 2>}]} {
    %c0 = arith.constant 0 : index
    %c0_0 = arith.constant 0 : index
    %0 = vector.load %arg1[%c0, %c0_0] : memref<8x4xf32, #tpu.memory_space<vmem>>, vector<8x4xf32>
    %1 = arith.truncf %0 : vector<8x4xf32> to vector<8x4xbf16>
    %c0_1 = arith.constant 0 : index
    %c0_2 = arith.constant 0 : index
    %2 = vector.load %arg2[%c0_1, %c0_2] : memref<4x32xbf16, #tpu.memory_space<vmem>>, vector<4x32xbf16>
    %cst = arith.constant dense<0.000000e+00> : vector<8x32xf32>
    %3 = tpu.matmul %1, %2, %cst {dimension_numbers = #tpu.dot_dimension_numbers<[1], [0], [0], [1], [0, 0, 1, 1], [], []>} : vector<8x4xbf16>, vector<4x32xbf16>, vector<8x32xf32> -> vector<8x32xf32>
    %c0_3 = arith.constant 0 : index
    %c0_4 = arith.constant 0 : index
    %4 = vector.load %arg3[%c0_3, %c0_4] : memref<1x32xf32, #tpu.memory_space<vmem>>, vector<1x32xf32>
    %5 = vector.broadcast %4 : vector<1x32xf32> to vector<8x32xf32>
    %6 = arith.addf %3, %5 : vector<8x32xf32>
    %cst_5 = arith.constant 0.000000e+00 : f32
    %7 = vector.broadcast %cst_5 : f32 to vector<8x32xf32>
    %8 = arith.maximumf %6, %7 : vector<8x32xf32>
    %9 = arith.truncf %8 : vector<8x32xf32> to vector<8x32xbf16>
    %c0_6 = arith.constant 0 : index
    %c0_7 = arith.constant 0 : index
    %10 = vector.load %arg4[%c0_6, %c0_7] : memref<32x32xbf16, #tpu.memory_space<vmem>>, vector<32x32xbf16>
    %cst_8 = arith.constant dense<0.000000e+00> : vector<8x32xf32>
    %11 = tpu.matmul %9, %10, %cst_8 {dimension_numbers = #tpu.dot_dimension_numbers<[1], [0], [0], [1], [0, 0, 1, 1], [], []>} : vector<8x32xbf16>, vector<32x32xbf16>, vector<8x32xf32> -> vector<8x32xf32>
    %c0_9 = arith.constant 0 : index
    %c0_10 = arith.constant 0 : index
    %12 = vector.load %arg5[%c0_9, %c0_10] : memref<1x32xf32, #tpu.memory_space<vmem>>, vector<1x32xf32>
    %13 = vector.broadcast %12 : vector<1x32xf32> to vector<8x32xf32>
    %14 = arith.addf %11, %13 : vector<8x32xf32>
    %cst_11 = arith.constant 0.000000e+00 : f32
    %15 = vector.broadcast %cst_11 : f32 to vector<8x32xf32>
    %16 = arith.maximumf %14, %15 : vector<8x32xf32>
    %17 = arith.truncf %16 : vector<8x32xf32> to vector<8x32xbf16>
    %c0_12 = arith.constant 0 : index
    %c0_13 = arith.constant 0 : index
    %18 = vector.load %arg6[%c0_12, %c0_13] : memref<32x128xbf16, #tpu.memory_space<vmem>>, vector<32x128xbf16>
    %cst_14 = arith.constant dense<0.000000e+00> : vector<8x128xf32>
    %19 = tpu.matmul %17, %18, %cst_14 {dimension_numbers = #tpu.dot_dimension_numbers<[1], [0], [0], [1], [0, 0, 1, 1], [], []>} : vector<8x32xbf16>, vector<32x128xbf16>, vector<8x128xf32> -> vector<8x128xf32>
    %c0_15 = arith.constant 0 : index
    %c0_16 = arith.constant 0 : index
    %20 = vector.load %arg7[%c0_15, %c0_16] : memref<1x128xf32, #tpu.memory_space<vmem>>, vector<1x128xf32>
    %21 = vector.broadcast %20 : vector<1x128xf32> to vector<8x128xf32>
    %22 = arith.addf %19, %21 : vector<8x128xf32>
    %23 = vector.extract_strided_slice %22 {offsets = [0, 0], sizes = [8, 2], strides = [1, 1]} : vector<8x128xf32> to vector<8x2xf32>
    %c0_17 = arith.constant 0 : index
    %c0_18 = arith.constant 0 : index
    %24 = vector.load %arg8[%c0_17, %c0_18] : memref<8x2xf32, #tpu.memory_space<vmem>>, vector<8x2xf32>
    tpu.vector_store %arg8[%c0_17, %c0_18], %23 {strides = array<i32>} : memref<8x2xf32, #tpu.memory_space<vmem>>, vector<8x2xf32>,
    return
  }
  func.func @transform_0(%arg0: i32) -> (i32, i32) {
    %c0_i32 = arith.constant 0 : i32
    %c0_i32_0 = arith.constant 0 : i32
    return %arg0, %c0_i32 : i32, i32
  }
  func.func @transform_1(%arg0: i32) -> (i32, i32) {
    %c0_i32 = arith.constant 0 : i32
    %c0_i32_0 = arith.constant 0 : i32
    %c0_i32_1 = arith.constant 0 : i32
    return %c0_i32, %c0_i32_0 : i32, i32
  }
  func.func @transform_2(%arg0: i32) -> (i32, i32) {
    %c0_i32 = arith.constant 0 : i32
    %c0_i32_0 = arith.constant 0 : i32
    %c0_i32_1 = arith.constant 0 : i32
    return %c0_i32, %c0_i32_0 : i32, i32
  }
  func.func @transform_3(%arg0: i32) -> (i32, i32) {
    %c0_i32 = arith.constant 0 : i32
    %c0_i32_0 = arith.constant 0 : i32
    %c0_i32_1 = arith.constant 0 : i32
    return %c0_i32, %c0_i32_0 : i32, i32
  }
  func.func @transform_4(%arg0: i32) -> (i32, i32) {
    %c0_i32 = arith.constant 0 : i32
    %c0_i32_0 = arith.constant 0 : i32
    %c0_i32_1 = arith.constant 0 : i32
    return %c0_i32, %c0_i32_0 : i32, i32
  }
  func.func @transform_5(%arg0: i32) -> (i32, i32) {
    %c0_i32 = arith.constant 0 : i32
    %c0_i32_0 = arith.constant 0 : i32
    %c0_i32_1 = arith.constant 0 : i32
    return %c0_i32, %c0_i32_0 : i32, i32
  }
  func.func @transform_6(%arg0: i32) -> (i32, i32) {
    %c0_i32 = arith.constant 0 : i32
    %c0_i32_0 = arith.constant 0 : i32
    %c0_i32_1 = arith.constant 0 : i32
    return %c0_i32, %c0_i32_0 : i32, i32
  }
  func.func @transform_7(%arg0: i32) -> (i32, i32) {
    %c0_i32 = arith.constant 0 : i32
    %c0_i32_0 = arith.constant 0 : i32
    return %arg0, %c0_i32 : i32, i32
  }
}

</mosaic_0001>

<bundles_post_ra>
// kernel: tpu_custom_call.1
= control target key start
LH: loop header
LB: loop body
LE: loop exit
PB: predicated region body
PF: predicated region fallthrough
CT: control target
= control target key end

     0   :  { %12 = vsyncpa [#allocation3], 0  ;;  %s405_s0 = inlined_call_operand.vmem [shape: f32[8,4], index: 0, kind: input, shape index: {}]   ;;  %s406_s1 = inlined_call_operand.hbm [shape: bf16[4,32], index: 1, kind: input, shape index: {}]   ;;  %s407_s2 = inlined_call_operand.hbm [shape: f32[1,32], index: 2, kind: input, shape index: {}]   ;;  %s408_s3 = inlined_call_operand.hbm [shape: bf16[32,32], index: 3, kind: input, shape index: {}]   ;;  %s409_s4 = inlined_call_operand.hbm [shape: f32[1,32], index: 4, kind: input, shape index: {}]   ;;  %s410_s5 = inlined_call_operand.vmem [shape: bf16[32,128], index: 5, kind: input, shape index: {}]   ;;  %s411_s6 = inlined_call_operand.vmem [shape: f32[1,128], index: 6, kind: input, shape index: {}]   ;;  %s412_s7 = inlined_call_operand.vmem [shape: f32[8,2], index: 7, kind: output, shape index: {}]  }
   0x1   :  { %13 = vsyncpa [#allocation5], 0  ;;  %s33_s26 = sshll.u32 %s407_s2, 4  ;;  %s34_s26 = int_to_ptr.hbm [resolvable:$true] %s33_s26 }
   0x2   :  { %14 = vsyncpa [#allocation8], 0  ;;  %s332_s27 = smov [#allocation4]   ;;  %s22_s8 = sshll.u32 %s406_s1, 4  ;;  %s23_s8 = int_to_ptr.hbm [resolvable:$true] %s22_s8 }
   0x3   :  { %s35_s28 = sshll.u32 %s332_s27, 4  ;;  %s333_s9 = smov [#allocation2]   ;;  %s36_s28 = int_to_ptr.vmem [resolvable:$true] %s35_s28 }
   0x4   :  { %38 = dma.hbm_to_vmem [thread:$0]  %s34_s26, 16, %s36_s28, [#allocation5]  }
   0x5   :  { %s24_s10 = sshll.u32 %s333_s9, 4  ;;  %s43_s13 = sshll.u32 %s408_s3, 4  ;;  %s25_s10 = int_to_ptr.vmem [resolvable:$true] %s24_s10  ;;  %s44_s13 = int_to_ptr.hbm [resolvable:$true] %s43_s13 }
   0x6   :  { %27 = dma.hbm_to_vmem [thread:$0]  %s23_s8, 32, %s25_s10, [#allocation3]  }
   0x7   :  { %s334_s2 = smov [#allocation6]   ;;  %s57_s17 = sshll.u32 %s409_s4, 4  ;;  %s58_s17 = int_to_ptr.hbm [resolvable:$true] %s57_s17 }
   0x8   :  { %s45_s14 = sshll.u32 %s334_s2, 4  ;;  %s335_s18 = smov 64   ;;  %s46_s14 = int_to_ptr.vmem [resolvable:$true] %s45_s14 }
   0x9   :  { %s336_s1 = smov 4   ;;  %s337_s19 = smov [#allocation7]  }
   0xa   :  { %51 = dma.hbm_to_vmem [thread:$0]  %s44_s13, 256, %s46_s14, [#allocation5], %s335_s18, %s335_s18, %s336_s1  }
   0xb   :  { %s59_s20 = sshll.u32 %s337_s19, 4  ;;  %s60_s20 = int_to_ptr.vmem [resolvable:$true] %s59_s20 }
   0xc   :  { %62 = dma.hbm_to_vmem [thread:$0]  %s58_s17, 16, %s60_s20, [#allocation8]  }
   0xd   :  { %326 = dma.done.wait [#allocation3], 32  }
   0xe   :  { %327 = vsyncadd [#allocation3], 4294967264 }
   0xf   :  { %328 = dma.done.wait [#allocation5], 272  }
  0x10   :  { %329 = vsyncadd [#allocation5], 4294967024 }
  0x11   :  { %330 = dma.done.wait [#allocation8], 16  }
  0x12   :  { %331 = vsyncadd [#allocation8], 4294967280  ;;  %vm95_vm0 = vcmask 1041408   ;;  %v86_v0 = vld [vmem:[#allocation2] sm:$0x3]  ;;  %v84_v1 = vld [vmem:[%s405_s0] sm:$0xff] }
  0x13   :  { %v97_v2 = vsel %vm95_vm0, %v86_v0, 0  ;;  %v85_v3 = vpack.c.bf16 %v84_v1, %v84_v1  ;;  %vm91_vm1 = vcmask 31744   ;;  %v218_v4 = vld [vmem:[#allocation6 + $0x8] sm:$0xff]  ;;  %v217_v5 = vld [vmem:[#allocation6] sm:$0xff]  ;;  %v227_v6 = vld [vmem:[#allocation4] ss:$0 sm:$0xff] }
  0x14   :  { %106 = vmatpush.bf16.msra.mxu0 %v97_v2  ;;  %144 = vmatpush.bf16.msra.mxu1 %v218_v4  ;;  %vm134_vm2 = vcmask 261120   ;;  %v220_v12 = vld [vmem:[%s410_s5 + $0x8] sm:$0xff]  ;;  %v219_v13 = vld [vmem:[%s410_s5] sm:$0xff]  ;;  %vm189_vm3 = vcmask 15360  }
  0x15   :  { %182 = vmatpush.bf16.msra.mxu2 %v220_v12  ;;  %v228_v14 = vld [vmem:[#allocation7] ss:$0 sm:$0xff]  ;;  %v229_v20 = vld [vmem:[%s411_s6] ss:$0 sm:$0xff] }
  0x17   :  { %198 = vmatmul.msk.bf16.vlgmr.msra.gmra.mxu0 %vm91_vm1, %v85_v3 }
  0x18   :  { %145 = vmatpush.bf16.msra.mxu1 %v217_v5 }
  0x19   :  { %183 = vmatpush.bf16.msra.mxu2 %v219_v13 }
  0x94   :  { %v108_v7 = vpop.f32.mrf.mxu0 }
  0x95   :  { %v109_v8 = vadd.f32 %v227_v6, %v108_v7 }
  0x97   :  { %v112_v9 = vmax.f32 %v109_v8, 0.0 }
  0x99   :  { %v113_v10 = vpack.c.bf16 %v112_v9, %v112_v9 }
  0x9b   :  { %207 = vmatmul.msk.bf16.vlgmr.msra.gmra.mxu1 %vm134_vm2, %v113_v10 }
  0x9c   :  { %v110_v11 = vpop.f32.mrf.mxu0 }
 0x118   :  { %v147_v15 = vpop.f32.mrf.mxu1 }
 0x119   :  { %v148_v16 = vadd.f32 %v228_v14, %v147_v15 }
 0x11b   :  { %v151_v17 = vmax.f32 %v148_v16, 0.0 }
 0x11d   :  { %v152_v18 = vpack.c.bf16 %v151_v17, %v151_v17 }
 0x11f   :  { %216 = vmatmul.msk.bf16.vlgmr.msra.gmra.mxu2 %vm134_vm2, %v152_v18 }
 0x120   :  { %v149_v19 = vpop.f32.mrf.mxu1 }
 0x1a2   :  { %v185_v21 = vpop.f32.mrf.mxu2 }
 0x1a3   :  { %v186_v22 = vadd.f32 %v229_v20, %v185_v21 }
 0x1a5   :  { %190 = vst.msk [vmem:[%s412_s7] sm:$0xff] %vm189_vm3, %v186_v22 }
 0x1aa   :  { %v187_v23 = vpop.f32.mrf.mxu2 }
 0x1ab   :  { %195 = vsyncpa [#allocation3], 1 }
 0x1ac   :  { %196 = vsyncpa [#allocation5], 1 }
 0x1ad   :  { %197 = vsyncpa [#allocation8], 1 }

</bundles_post_ra>
